<compile_context>
chip_gen: v7x
topology: tpu7x:2x2x1
jax: 0.10.0
libtpu: 0.0.40
codegen_flags: <defaults>
</compile_context>

<pallas_src>
import functools

import jax
import jax.numpy as jnp
from jax import lax
from jax.experimental import pallas as pl
from jax.experimental.pallas import tpu as pltpu


def logreg_kernel(x_ref, w_ref, b_ref, out_ref):
    # x_ref:   (TM, K)  tile of input rows
    # w_ref:   (C, K)   full weight in its native lane-dense nn.Linear layout
    # b_ref:   (1, C)   bias (f32)
    # out_ref: (TM, C)  output tile
    acc = lax.dot_general(
        x_ref[...],
        w_ref[...],
        dimension_numbers=(((1,), (1,)), ((), ())),   # contract over K
        preferred_element_type=jnp.float32,
    )
    out_ref[...] = (acc + b_ref[...].astype(jnp.float32)).astype(out_ref.dtype)


def _round_up(v, m):
    return ((v + m - 1) // m) * m


def _choose_row_tile(N, K, itemsize, block_rows=None, vmem_budget_bytes=8 << 20):
    """Pick an 8-aligned row tile bounded by a VMEM budget for the x buffers."""
    n_aligned = _round_up(max(N, 1), 8)
    if block_rows is not None:
        tm = max(8, (int(block_rows) // 8) * 8)
        return min(tm, n_aligned)
    # Double-buffered x tile is the dominant VMEM allocation: 2 * tm * K * isz.
    cap = vmem_budget_bytes // (2 * K * itemsize)
    cap = max(8, min(int(cap), 2048))
    cap = (cap // 8) * 8
    if n_aligned <= cap:
        # Small N: still give the grid >= 2 steps so v7x's two TensorCores
        # both get work and the pipeline actually overlaps something.
        if n_aligned > 8:
            return _round_up(pl.cdiv(N, 2), 8)
        return 8
    return cap


def logreg_forward(x, weight, bias, *, block_rows=None, compute_dtype=None,
                   vmem_budget_bytes=8 << 20):
    """x: (N, hid_dim); weight: (n_classes, hid_dim); bias: (n_classes,)."""
    N, K = x.shape
    C = weight.shape[0]
    out_dtype = x.dtype

    # Optional bf16 input path (halves the dominant HBM read on v6e/v7x).
    # Accumulation stays f32 via preferred_element_type; bias add stays f32.
    if compute_dtype is not None:
        x = x.astype(compute_dtype)
        weight = weight.astype(compute_dtype)

    itemsize = jnp.dtype(x.dtype).itemsize
    tm = _choose_row_tile(N, K, itemsize, block_rows, vmem_budget_bytes)

    # Pad the batch up to a multiple of the tile (never fall back to one giant
    # whole-array block).  Padded rows are zeros and are sliced off below.
    n_padded = _round_up(N, tm)
    if n_padded != N:
        x = jnp.pad(x, ((0, n_padded - N), (0, 0)))
    grid = (n_padded // tm,)

    b2d = bias.reshape(1, C).astype(jnp.float32)

    grid_spec = pltpu.PrefetchScalarGridSpec(
        num_scalar_prefetch=0,
        grid=grid,
        in_specs=[
            pl.BlockSpec((tm, K), lambda i: (i, 0)),   # x rows for this step
            pl.BlockSpec((C, K), lambda i: (0, 0)),    # full weight, lane-dense
            pl.BlockSpec((1, C), lambda i: (0, 0)),    # full bias
        ],
        out_specs=pl.BlockSpec((tm, C), lambda i: (i, 0)),
    )

    cost = pl.CostEstimate(
        flops=2 * n_padded * K * C,
        transcendentals=0,
        bytes_accessed=(n_padded * K * itemsize          # stream x
                        + C * K * itemsize               # weight
                        + 4 * C                          # bias
                        + n_padded * C * jnp.dtype(out_dtype).itemsize),
    )

    out = pl.pallas_call(
        logreg_kernel,
        out_shape=jax.ShapeDtypeStruct((n_padded, C), out_dtype),
        grid_spec=grid_spec,
        compiler_params=pltpu.CompilerParams(
            # Independent row tiles -> shard across TensorCores on v7x.
            dimension_semantics=("parallel",),
        ),
        cost_estimate=cost,
    )(x, weight, b2d)

    if n_padded != N:
        out = out[:N]
    return out


def logreg_reference(x, weight, bias):
    # Pure-JAX mirror of the PyTorch forward: nn.Linear => x @ W.T + b
    return x @ weight.T + bias


if __name__ == "__main__":
    # Small shapes consistent with LogReg: (num_samples, hid_dim) -> n_classes.
    N, HID, NCLS = 256, 512, 16

    key = jax.random.PRNGKey(0)
    kx, kw, kb = jax.random.split(key, 3)

    x = jax.random.normal(kx, (N, HID), dtype=jnp.float32)
    # Deterministic synthetic parameters (shapes from nn.Linear(hid_dim, n_classes)).
    weight = jax.random.normal(kw, (NCLS, HID), dtype=jnp.float32) * (1.0 / jnp.sqrt(HID))
    bias = jax.random.normal(kb, (NCLS,), dtype=jnp.float32) * 0.01

    fwd = jax.jit(functools.partial(logreg_forward))
    out = jax.block_until_ready(fwd(x, weight, bias))

    out_ref = logreg_reference(x, weight, bias)
    assert out.shape == (N, NCLS)
    assert jnp.allclose(out, out_ref, atol=1e-4, rtol=1e-4)

    # Exercise the padded / ragged-N path too (N not divisible by the tile).
    xr = x[:173]
    out_ragged = jax.block_until_ready(logreg_forward(xr, weight, bias))
    assert out_ragged.shape == (173, NCLS)
    assert jnp.allclose(out_ragged, logreg_reference(xr, weight, bias),
                        atol=1e-4, rtol=1e-4)

    print("KERNEL_OK")
</pallas_src>

<mosaic_0001>
module attributes {stable_mosaic.version = 11 : i64} {
  func.func @logreg_kernel(%arg0: i32, %arg1: memref<128x512xf32, #tpu.memory_space<vmem>>, %arg2: memref<16x512xf32, #tpu.memory_space<vmem>>, %arg3: memref<1x16xf32, #tpu.memory_space<vmem>>, %arg4: memref<128x16xf32, #tpu.memory_space<vmem>>) attributes {dimension_semantics = [#tpu.dimension_semantics<parallel>], iteration_bounds = array<i64: 2>, scalar_prefetch = 0 : i64, scratch_operands = 0 : i64, tpu.core_type = #tpu.core_type<tc>, window_params = [{transform_indices = @transform_0, window_bounds = array<i64: 128, 512>}, {pipeline_mode = #tpu.pipeline_mode<synchronous>, transform_indices = @transform_1, window_bounds = array<i64: 16, 512>}, {pipeline_mode = #tpu.pipeline_mode<synchronous>, transform_indices = @transform_2, window_bounds = array<i64: 1, 16>}, {transform_indices = @transform_3, window_bounds = array<i64: 128, 16>}]} {
    %c0 = arith.constant 0 : index
    %c0_0 = arith.constant 0 : index
    %0 = vector.load %arg1[%c0, %c0_0] : memref<128x512xf32, #tpu.memory_space<vmem>>, vector<128x512xf32>
    %c0_1 = arith.constant 0 : index
    %c0_2 = arith.constant 0 : index
    %1 = vector.load %arg2[%c0_1, %c0_2] : memref<16x512xf32, #tpu.memory_space<vmem>>, vector<16x512xf32>
    %cst = arith.constant dense<0.000000e+00> : vector<128x16xf32>
    %2 = tpu.matmul %0, %1, %cst {dimension_numbers = #tpu.dot_dimension_numbers<[1], [1], [0], [0], [0, 0, 1, 0], [], []>} : vector<128x512xf32>, vector<16x512xf32>, vector<128x16xf32> -> vector<128x16xf32>
    %c0_3 = arith.constant 0 : index
    %c0_4 = arith.constant 0 : index
    %3 = vector.load %arg3[%c0_3, %c0_4] : memref<1x16xf32, #tpu.memory_space<vmem>>, vector<1x16xf32>
    %4 = vector.broadcast %3 : vector<1x16xf32> to vector<128x16xf32>
    %5 = arith.addf %2, %4 : vector<128x16xf32>
    %c0_5 = arith.constant 0 : index
    %c0_6 = arith.constant 0 : index
    %6 = vector.load %arg4[%c0_5, %c0_6] : memref<128x16xf32, #tpu.memory_space<vmem>>, vector<128x16xf32>
    tpu.vector_store %arg4[%c0_5, %c0_6], %5 {strides = array<i32>} : memref<128x16xf32, #tpu.memory_space<vmem>>, vector<128x16xf32>,
    return
  }
  func.func @transform_0(%arg0: i32) -> (i32, i32) {
    %c0_i32 = arith.constant 0 : i32
    %c0_i32_0 = arith.constant 0 : i32
    return %arg0, %c0_i32 : i32, i32
  }
  func.func @transform_1(%arg0: i32) -> (i32, i32) {
    %c0_i32 = arith.constant 0 : i32
    %c0_i32_0 = arith.constant 0 : i32
    %c0_i32_1 = arith.constant 0 : i32
    return %c0_i32, %c0_i32_0 : i32, i32
  }
  func.func @transform_2(%arg0: i32) -> (i32, i32) {
    %c0_i32 = arith.constant 0 : i32
    %c0_i32_0 = arith.constant 0 : i32
    %c0_i32_1 = arith.constant 0 : i32
    return %c0_i32, %c0_i32_0 : i32, i32
  }
  func.func @transform_3(%arg0: i32) -> (i32, i32) {
    %c0_i32 = arith.constant 0 : i32
    %c0_i32_0 = arith.constant 0 : i32
    return %arg0, %c0_i32 : i32, i32
  }
}

</mosaic_0001>

<bundles_post_ra>
// kernel: logreg_forward.1
= control target key start
LH: loop header
LB: loop body
LE: loop exit
PB: predicated region body
PF: predicated region fallthrough
CT: control target
= control target key end

     0   :  { %8 = vsyncpa [#allocation3], 0  ;;  %s1177_s0 = inlined_call_operand.hbm [shape: f32[256,512], index: 0, kind: input, shape index: {}]   ;;  %s1178_s1 = inlined_call_operand.hbm [shape: f32[16,512], index: 1, kind: input, shape index: {}]   ;;  %s1179_s2 = inlined_call_operand.vmem [shape: f32[1,16], index: 2, kind: input, shape index: {}]   ;;  %s1180_s3 = inlined_call_operand.vmem [shape: f32[256,16], index: 3, kind: output, shape index: {}]  }
   0x1   :  { %10 = vsyncpa [#allocation3 + $0x1], 0 }
   0x2   :  { %11 = vsyncpa [#allocation5], 0  ;;  %s905_s12 = smov 0   ;;  %s907_s13 = smov 0  }
   0x3   :  { %s909_s14 = smov 0   ;;  %s911_s15 = smov 0  }
   0x4 LB: > { %s672_s16 = sadd.s32 4294967295, %s879_s15   ;;  %p37_p0 = scmp.ne.s32.totalorder %s871_s13, %s867_s12  ;;  %s879_s15 = sphi %s911_s15, %s1196_s15   ;;  %s875_s14 = sphi %s909_s14, %s1195_s14   ;;  %s871_s13 = sphi %s907_s13, %s1194_s13   ;;  %s867_s12 = sphi %s905_s12, %s1193_s12  }
   0x5   : > { %p927_p1 = scmp.eq.s32.totalorder %s672_s16, 0  ;;  %p674_p2 = scmp.ge.s32.totalorder %s879_s15, 1 }
   0x6   : > { %p116_p3 = scmp.lt.s32.totalorder %s879_s15, 3  ;;  %s881_s20 = smov [#allocation4]  }
   0x7   : > { %s1185_s17 = scalar_select %p927_p1, 1, 0 }
   0x8   : > { %p935_p4 = por %p927_p1, %p37_p0  ;;  %p939_p5 = pnand %p674_p2, %p116_p3 }
   0x9   : > { %s128_s21 = sshll.u32 %s881_s20, 4  ;;  %s952_s23 = sadd.s32 1, %s879_s15   ;;  %s129_s21 = int_to_ptr.vmem [resolvable:$true] %s128_s21 }
   0xa   : > { %s1186_s18 = scalar_select %p935_p4, 1, 0 }
   0xb   : > { %s1187_s19 = scalar_select %p939_p5, 1, 0 }
   0xc   : > { %p737_p6 = pneg %p939_p5  ;;  %s24_s24 = sadd.s32 1, %s875_s14 }
   0xd   : > { %s21_s25 = ssub.s32 %s879_s15, %s952_s23  ;;  %s783_s28 = scalar_lea.hbm %s1178_s1, 1024 }
   0xe   : > { %p947_p7 = pnand %p737_p6, %p927_p1  ;;  %p784_p8 = scmp.ne.s32.totalorder %s1178_s1, %s783_s28 }
   0xf   : > { %p790_p12 = scmp.lt.u32.totalorder %s783_s28, %s1178_s1 }
  0x10   : > { %p785_p9 = pneg %p947_p7 }
  0x12   : > { %p786_p10 = pnand %p785_p9, %p784_p8 }
  0x14   : > { %p787_p11 = pneg %p786_p10 }
  0x16   : > { %p792_p13 = pnand %p790_p12, %p787_p11 }
  0x18   : > { %795 = shalt.err (!%p792_p13)
}
  0x19   : > { %s796_s6 = scalar_lea.vmem %s129_s21, 1024  ;;  %p804_p6 = scmp.lt.s32.totalorder %s129_s21, %s129_s21 }
  0x1a   : > { %p797_p0 = scmp.ne.s32.totalorder %s129_s21, %s796_s6  ;;  %p805_p1 = scmp.lt.s32.totalorder %s796_s6, %s796_s6 }
  0x1c   : > { %p799_p2 = pnand %p797_p0, %p785_p9  ;;  %p806_p4 = por %p805_p1, %p804_p6 }
  0x1e   : > { %p800_p3 = pneg %p799_p2 }
  0x20   : > { %p807_p5 = pnand %p806_p4, %p800_p3 }
  0x22   : > { %810 = shalt.err (!%p807_p5)
}
  0x23   : > { %s882_s7 = smov 512   ;;  %s883_s8 = smov 32  }
  0x24   : > { %740 = dma.hbm_to_vmem [thread:$0]  (!%p947_p7), %s1178_s1, 1024, %s129_s21, [#allocation5], %s882_s7, %s882_s7, %s883_s8  }
  0x25   : > { %p22_p1 = scmp.eq.s32.totalorder %s21_s25, 0  ;;  %p31_p4 = scmp.ne.s32.totalorder %s875_s14, %s871_s13 }
  0x26   : > { %p32_p5 = scmp.eq.s32.totalorder %s879_s15, 0  ;;  %p746_p8 = scmp.lt.s32.totalorder %s879_s15, 2 }
  0x27   : > { %s981_s11 = scalar_select %p22_p1, %s875_s14, %s24_s24  }
  0x28   : > { %p33_p9 = por %p32_p5, %p31_p4  ;;  %s145_s12 = sand.u32 1, %s875_s14  }
  0x29   : > { %s677_s20 = sshll.u32 %s145_s12, 9  ;;  %s690_s26 = sshll.u32 %s879_s15, 13 }
  0x2a   : > { %s988_s22 = scalar_lea.hbm %s1177_s0, %s690_s26  ;;  %s149_s21 = scalar_lea.vmem [#allocation2], %s677_s20 }
  0x2b   : > { %s157_s25 = sshll.u32 %s149_s21, 4  ;;  %p992_p7 = pnand %p746_p8, %p33_p9  ;;  %s990_s25 = int_to_ptr.vmem [resolvable:$true] %s157_s25 }
  0x2c   : > { %s996_s29 = scalar_lea.sflag [#allocation3], %s145_s12  ;;  %s811_s30 = scalar_lea.hbm %s988_s22, 8192 }
  0x2d   : > { %p812_p10 = scmp.ne.s32.totalorder %s988_s22, %s811_s30  ;;  %p813_p11 = pneg %p992_p7 }
  0x2e   : > { %s816_s6 = scalar_lea.hbm %s1177_s0, 16384  ;;  %p817_p0 = scmp.lt.u32.totalorder %s988_s22, %s1177_s0 }
  0x2f   : > { %p814_p12 = pnand %p813_p11, %p812_p10  ;;  %p818_p2 = scmp.lt.u32.totalorder %s816_s6, %s811_s30 }
  0x30   : > { %p820_p6 = scmp.lt.u32.totalorder %s811_s30, %s988_s22 }
  0x31   : > { %p815_p13 = pneg %p814_p12  ;;  %p819_p3 = por %p818_p2, %p817_p0 }
  0x33   : > { %p821_p1 = por %p820_p6, %p819_p3 }
  0x35   : > { %p822_p4 = pnand %p821_p1, %p815_p13 }
  0x37   : > { %825 = shalt.err (!%p822_p4)
}
  0x38   : > { %s826_s12 = scalar_lea.vmem %s990_s25, 8192  ;;  %s884_s20 = smov [#allocation2]  }
  0x39   : > { %p827_p5 = scmp.ne.s32.totalorder %s990_s25, %s826_s12  ;;  %s831_s26 = sshll.u32 %s884_s20, 4  ;;  %s832_s26 = int_to_ptr.vmem [resolvable:$false] %s831_s26 }
  0x3a   : > { %s833_s27 = scalar_lea.vmem %s832_s26, 16384  ;;  %p834_p10 = scmp.lt.s32.totalorder %s990_s25, %s832_s26 }
  0x3b   : > { %p829_p8 = pnand %p827_p5, %p813_p11  ;;  %p835_p12 = scmp.lt.s32.totalorder %s833_s27, %s826_s12 }
  0x3d   : > { %p830_p9 = pneg %p829_p8  ;;  %p836_p0 = por %p835_p12, %p834_p10 }
  0x3f   : > { %p837_p2 = pnand %p836_p0, %p830_p9 }
  0x41   : > { %840 = shalt.err (!%p837_p2)
}
  0x42   : > { %744 = dma.hbm_to_vmem [thread:$0]  (!%p992_p7), %s988_s22, 8192, %s990_s25, %s996_s29, %s882_s7, %s882_s7, %s883_s8  }
  0x43   : > { %p1190_p11 = scmp.ne.s32.totalorder %s1187_s19, 0 }
  0x44   : > { %s171_s28 = sand.u32 (!%p1190_p11), 1, %s871_s13   ;;  %p1191_p13 = scmp.ne.s32.totalorder (!%p1190_p11), %s1186_s18, 0 }
  0x45   : > { %169 = sbr.rel (%p1190_p11) target bundleno = 369 (0x171), region = 32  ;;  %s682_s21 = sshll.u32 (!%p1190_p11), %s171_s28, 9 }
  0x46   : > { %s172_s30 = scalar_lea.sflag (!%p1190_p11), [#allocation3], %s171_s28  ;;  %s1030_s4 = scalar_lea.vmem (!%p1190_p11), [#allocation2], %s682_s21 }
  0x4c   : > { %858 = dma.done.wait (%p1191_p13), %s172_s30, 8192  }
  0x4d   : > { %860 = vsyncadd (%p1191_p13), %s172_s30, 4294959104  ;;  %p1192_p3 = scmp.ne.s32.totalorder %s1185_s17, 0 }
  0x4f   : > { %862 = dma.done.wait (%p1192_p3), [#allocation5], 1024  }
  0x50   : > { %864 = vsyncadd (%p1192_p3), [#allocation5], 4294966272  ;;  %v274_v0 = vld [vmem:[#allocation4 + $0x8] sm:$0xff]  ;;  %v273_v2 = vld [vmem:[#allocation4] sm:$0xff]  ;;  %s684_s17 = sshll.u32 %s672_s16, 4  ;;  %vm578_vm0 = vcmask 130048  }
  0x51   : > { %v278_v1 = vld [vmem:[#allocation4 + $0x28] sm:$0xff]  ;;  %v277_v4 = vld [vmem:[#allocation4 + $0x20] sm:$0xff]  ;;  %v276_v5 = vld [vmem:[#allocation4 + $0x18] sm:$0xff]  ;;  %p204_p7 = scmp.lt.s32.totalorder %s684_s17, 31 }
  0x52   : > { %v691_v3 = vpack.c.bf16 %v278_v1, %v274_v0  ;;  %v280_v6 = vld [vmem:[#allocation4 + $0x38] sm:$0xff]  ;;  %v693_v7 = vpack.c.bf16 %v277_v4, %v273_v2  ;;  %v275_v9 = vld [vmem:[#allocation4 + $0x10] sm:$0xff]  ;;  %v210_v11 = vld [vmem:[%s1030_s4 + $0x8] sm:$0xff] }
  0x53   : > { %v695_v8 = vpack.c.bf16 %v280_v6, %v276_v5  ;;  %v279_v10 = vld [vmem:[#allocation4 + $0x30] sm:$0xff]  ;;  %352 = vmatprep.mubr.f32.mxu1 %v210_v11  ;;  %v212_v13 = vld [vmem:[%s1030_s4 + $0x18] sm:$0xff]  ;;  %v209_v14 = vld [vmem:[%s1030_s4] sm:$0xff]  ;;  %s1198_s17 = smov (!%p204_p7, %s684_s17), 31 }
  0x54   : > { %692 = vmatprep.subr.bf16.mxu1 %v691_v3  ;;  %v697_v12 = vpack.c.bf16 %v279_v10, %v275_v9  ;;  %497 = vmatprep.mubr.f32.mxu0 %v212_v13  ;;  %v211_v15 = vld [vmem:[%s1030_s4 + $0x10] sm:$0xff]  ;;  %v214_v16 = vld [vmem:[%s1030_s4 + $0x28] sm:$0xff]  ;;  %v216_v17 = vld [vmem:[%s1030_s4 + $0x38] sm:$0xff]  ;;  %s685_s7 = sshll.u32 %s1198_s17, 3 }
  0x55   : > { %694 = vmatpush1.bf16.xpose.msra.mxu1 %v693_v7  ;;  %696 = vmatprep.subr.bf16.mxu0 %v695_v8  ;;  %v213_v18 = vld [vmem:[%s1030_s4 + $0x20] sm:$0xff]  ;;  %v215_v19 = vld [vmem:[%s1030_s4 + $0x30] sm:$0xff]  ;;  %v218_v20 = vld [vmem:[%s1030_s4 + $0x48] sm:$0xff]  ;;  %s1115_s25 = scalar_lea.vmem %s1180_s3, %s685_s7 }
  0x56   : > { %698 = vmatpush1.bf16.xpose.msra.mxu0 %v697_v12  ;;  %v220_v21 = vld [vmem:[%s1030_s4 + $0x58] sm:$0xff]  ;;  %v217_v22 = vld [vmem:[%s1030_s4 + $0x40] sm:$0xff]  ;;  %v219_v23 = vld [vmem:[%s1030_s4 + $0x50] sm:$0xff] }
  0x57   : > { %v222_v24 = vld [vmem:[%s1030_s4 + $0x68] sm:$0xff]  ;;  %v224_v25 = vld [vmem:[%s1030_s4 + $0x78] sm:$0xff]  ;;  %v221_v26 = vld [vmem:[%s1030_s4 + $0x60] sm:$0xff] }
  0x58   : > { %v223_v27 = vld [vmem:[%s1030_s4 + $0x70] sm:$0xff]  ;;  %v226_v28 = vld [vmem:[%s1030_s4 + $0x88] sm:$0xff]  ;;  %v228_v29 = vld [vmem:[%s1030_s4 + $0x98] sm:$0xff] }
  0x59   : > { %v225_v30 = vld [vmem:[%s1030_s4 + $0x80] sm:$0xff]  ;;  %v227_v31 = vld [vmem:[%s1030_s4 + $0x90] sm:$0xff]  ;;  %v230_v32 = vld [vmem:[%s1030_s4 + $0xa8] sm:$0xff] }
  0x5a   : > { %v232_v33 = vld [vmem:[%s1030_s4 + $0xb8] sm:$0xff]  ;;  %v229_v34 = vld [vmem:[%s1030_s4 + $0xa0] sm:$0xff]  ;;  %v231_v35 = vld [vmem:[%s1030_s4 + $0xb0] sm:$0xff] }
  0x5b   : > { %v234_v36 = vld [vmem:[%s1030_s4 + $0xc8] sm:$0xff]  ;;  %v236_v37 = vld [vmem:[%s1030_s4 + $0xd8] sm:$0xff]  ;;  %v233_v38 = vld [vmem:[%s1030_s4 + $0xc0] sm:$0xff] }
  0x5c   : > { %353 = vmatmul.mubr.f32.vlgmr.msra.gmra.mrb[0].mxu1 %v209_v14  ;;  %v235_v39 = vld [vmem:[%s1030_s4 + $0xd0] sm:$0xff]  ;;  %v238_v40 = vld [vmem:[%s1030_s4 + $0xe8] sm:$0xff]  ;;  %v240_v41 = vld [vmem:[%s1030_s4 + $0xf8] sm:$0xff] }
  0x5d   : > { %498 = vmatmul.mubr.f32.vlgmr.msra.gmra.mrb[0].mxu0 %v211_v15  ;;  %357 = vmatprep.mubr.f32.mxu1 %v214_v16  ;;  %v237_v42 = vld [vmem:[%s1030_s4 + $0xe0] sm:$0xff]  ;;  %v239_v43 = vld [vmem:[%s1030_s4 + $0xf0] sm:$0xff]  ;;  %v242_v44 = vld [vmem:[%s1030_s4 + $0x108] sm:$0xff] }
  0x5e   : > { %502 = vmatprep.mubr.f32.mxu0 %v216_v17  ;;  %v244_v45 = vld [vmem:[%s1030_s4 + $0x118] sm:$0xff]  ;;  %v241_v46 = vld [vmem:[%s1030_s4 + $0x100] sm:$0xff]  ;;  %v243_v47 = vld [vmem:[%s1030_s4 + $0x110] sm:$0xff] }
  0x5f   : > { %v246_v48 = vld [vmem:[%s1030_s4 + $0x128] sm:$0xff]  ;;  %v248_v49 = vld [vmem:[%s1030_s4 + $0x138] sm:$0xff]  ;;  %v245_v50 = vld [vmem:[%s1030_s4 + $0x120] sm:$0xff] }
  0x60   : > { %358 = vmatmul.mubr.f32.gmra.mrb[2].mxu1 %v213_v18  ;;  %v247_v51 = vld [vmem:[%s1030_s4 + $0x130] sm:$0xff]  ;;  %v250_v52 = vld [vmem:[%s1030_s4 + $0x148] sm:$0xff]  ;;  %v252_v53 = vld [vmem:[%s1030_s4 + $0x158] sm:$0xff] }
  0x61   : > { %503 = vmatmul.mubr.f32.gmra.mrb[2].mxu0 %v215_v19  ;;  %362 = vmatprep.mubr.f32.mxu1 %v218_v20  ;;  %v249_v54 = vld [vmem:[%s1030_s4 + $0x140] sm:$0xff]  ;;  %v251_v55 = vld [vmem:[%s1030_s4 + $0x150] sm:$0xff]  ;;  %v254_v56 = vld [vmem:[%s1030_s4 + $0x168] sm:$0xff] }
  0x62   : > { %507 = vmatprep.mubr.f32.mxu0 %v220_v21  ;;  %v256_v57 = vld [vmem:[%s1030_s4 + $0x178] sm:$0xff]  ;;  %v253_v58 = vld [vmem:[%s1030_s4 + $0x160] sm:$0xff]  ;;  %v255_v59 = vld [vmem:[%s1030_s4 + $0x170] sm:$0xff] }
  0x63   : > { %v258_v60 = vld [vmem:[%s1030_s4 + $0x188] sm:$0xff]  ;;  %v260_v61 = vld [vmem:[%s1030_s4 + $0x198] sm:$0xff]  ;;  %v257_v62 = vld [vmem:[%s1030_s4 + $0x180] sm:$0xff] }
  0x64   : > { %363 = vmatmul.mubr.f32.gmra.mrb[4].mxu1 %v217_v22  ;;  %v259_v63 = vld [vmem:[%s1030_s4 + $0x190] sm:$0xff]  ;;  %v262_v0 = vld [vmem:[%s1030_s4 + $0x1a8] sm:$0xff]  ;;  %v264_v1 = vld [vmem:[%s1030_s4 + $0x1b8] sm:$0xff] }
  0x65   : > { %508 = vmatmul.mubr.f32.gmra.mrb[4].mxu0 %v219_v23  ;;  %367 = vmatprep.mubr.f32.mxu1 %v222_v24  ;;  %v261_v2 = vld [vmem:[%s1030_s4 + $0x1a0] sm:$0xff]  ;;  %v263_v3 = vld [vmem:[%s1030_s4 + $0x1b0] sm:$0xff]  ;;  %v266_v4 = vld [vmem:[%s1030_s4 + $0x1c8] sm:$0xff] }
  0x66   : > { %512 = vmatprep.mubr.f32.mxu0 %v224_v25  ;;  %v268_v5 = vld [vmem:[%s1030_s4 + $0x1d8] sm:$0xff]  ;;  %v265_v6 = vld [vmem:[%s1030_s4 + $0x1c0] sm:$0xff]  ;;  %v267_v7 = vld [vmem:[%s1030_s4 + $0x1d0] sm:$0xff] }
  0x67   : > { %v270_v8 = vld [vmem:[%s1030_s4 + $0x1e8] sm:$0xff]  ;;  %v272_v9 = vld [vmem:[%s1030_s4 + $0x1f8] sm:$0xff]  ;;  %v269_v10 = vld [vmem:[%s1030_s4 + $0x1e0] sm:$0xff] }
  0x68   : > { %368 = vmatmul.mubr.f32.gmra.mrb[6].mxu1 %v221_v26  ;;  %v271_v11 = vld [vmem:[%s1030_s4 + $0x1f0] sm:$0xff]  ;;  %v1109_v12 = vld [vmem:[%s1179_s2] ss:$0 sm:$0xff] }
  0x69   : > { %513 = vmatmul.mubr.f32.gmra.mrb[6].mxu0 %v223_v27  ;;  %372 = vmatprep.mubr.f32.mxu1 %v226_v28 }
  0x6a   : > { %517 = vmatprep.mubr.f32.mxu0 %v228_v29 }
  0x6c   : > { %373 = vmatmul.mubr.f32.gmra.mrb[8].mxu1 %v225_v30 }
  0x6d   : > { %518 = vmatmul.mubr.f32.gmra.mrb[8].mxu0 %v227_v31  ;;  %377 = vmatprep.mubr.f32.mxu1 %v230_v32 }
  0x6e   : > { %522 = vmatprep.mubr.f32.mxu0 %v232_v33 }
  0x70   : > { %378 = vmatmul.mubr.f32.gmra.mrb[10].mxu1 %v229_v34 }
  0x71   : > { %523 = vmatmul.mubr.f32.gmra.mrb[10].mxu0 %v231_v35  ;;  %382 = vmatprep.mubr.f32.mxu1 %v234_v36 }
  0x72   : > { %527 = vmatprep.mubr.f32.mxu0 %v236_v37 }
  0x74   : > { %383 = vmatmul.mubr.f32.gmra.mrb[12].mxu1 %v233_v38 }
  0x75   : > { %528 = vmatmul.mubr.f32.gmra.mrb[12].mxu0 %v235_v39  ;;  %387 = vmatprep.mubr.f32.mxu1 %v238_v40 }
  0x76   : > { %532 = vmatprep.mubr.f32.mxu0 %v240_v41 }
  0x78   : > { %388 = vmatmul.mubr.f32.gmra.mrb[14].mxu1 %v237_v42 }
  0x79   : > { %533 = vmatmul.mubr.f32.gmra.mrb[14].mxu0 %v239_v43  ;;  %392 = vmatprep.mubr.f32.mxu1 %v242_v44 }
  0x7a   : > { %537 = vmatprep.mubr.f32.mxu0 %v244_v45 }
  0x7c   : > { %393 = vmatmul.mubr.f32.gmra.mrb[16].mxu1 %v241_v46 }
  0x7d   : > { %538 = vmatmul.mubr.f32.gmra.mrb[16].mxu0 %v243_v47  ;;  %397 = vmatprep.mubr.f32.mxu1 %v246_v48 }
  0x7e   : > { %542 = vmatprep.mubr.f32.mxu0 %v248_v49 }
  0x80   : > { %398 = vmatmul.mubr.f32.gmra.mrb[18].mxu1 %v245_v50 }
  0x81   : > { %543 = vmatmul.mubr.f32.gmra.mrb[18].mxu0 %v247_v51  ;;  %402 = vmatprep.mubr.f32.mxu1 %v250_v52 }
  0x82   : > { %547 = vmatprep.mubr.f32.mxu0 %v252_v53 }
  0x84   : > { %403 = vmatmul.mubr.f32.gmra.mrb[20].mxu1 %v249_v54 }
  0x85   : > { %548 = vmatmul.mubr.f32.gmra.mrb[20].mxu0 %v251_v55  ;;  %407 = vmatprep.mubr.f32.mxu1 %v254_v56 }
  0x86   : > { %552 = vmatprep.mubr.f32.mxu0 %v256_v57 }
  0x88   : > { %408 = vmatmul.mubr.f32.gmra.mrb[22].mxu1 %v253_v58 }
  0x89   : > { %553 = vmatmul.mubr.f32.gmra.mrb[22].mxu0 %v255_v59  ;;  %412 = vmatprep.mubr.f32.mxu1 %v258_v60 }
  0x8a   : > { %557 = vmatprep.mubr.f32.mxu0 %v260_v61 }
  0x8c   : > { %413 = vmatmul.mubr.f32.gmra.mrb[24].mxu1 %v257_v62 }
  0x8d   : > { %558 = vmatmul.mubr.f32.gmra.mrb[24].mxu0 %v259_v63  ;;  %417 = vmatprep.mubr.f32.mxu1 %v262_v0 }
  0x8e   : > { %562 = vmatprep.mubr.f32.mxu0 %v264_v1 }
  0x90   : > { %418 = vmatmul.mubr.f32.gmra.mrb[26].mxu1 %v261_v2 }
  0x91   : > { %563 = vmatmul.mubr.f32.gmra.mrb[26].mxu0 %v263_v3  ;;  %422 = vmatprep.mubr.f32.mxu1 %v266_v4 }
  0x92   : > { %567 = vmatprep.mubr.f32.mxu0 %v268_v5 }
  0x94   : > { %423 = vmatmul.mubr.f32.gmra.mrb[28].mxu1 %v265_v6 }
  0x95   : > { %568 = vmatmul.mubr.f32.gmra.mrb[28].mxu0 %v267_v7  ;;  %427 = vmatprep.mubr.f32.mxu1 %v270_v8 }
  0x96   : > { %572 = vmatprep.mubr.f32.mxu0 %v272_v9 }
  0x98   : > { %428 = vmatmul.mubr.f32.gmra.mrb[30].mxu1 %v269_v10 }
  0x99   : > { %573 = vmatmul.mubr.f32.gmra.mrb[30].mxu0 %v271_v11 }
 0x12f   : > { %v354_v13 = vpop.f32.mrb[0].mxu1 }
 0x130   : > { %v355_v14 = vadd.f32 %v1109_v12, %v354_v13  ;;  %v356_v15 = vpop.f32.mrb[1].mxu1  ;;  %v499_v16 = vpop.f32.mrb[0].mxu0 }
 0x131   : > { %v501_v17 = vpop.f32.mrb[1].mxu0 }
 0x132   : > { %v500_v18 = vadd.f32 %v499_v16, %v355_v14 }
 0x133   : > { %v359_v19 = vpop.f32.mrb[2].mxu1 }
 0x134   : > { %579 = vst.msk [vmem:[%s1115_s25] sm:$0xff] %vm578_vm0, %v500_v18  ;;  %v360_v20 = vadd.f32 %v1109_v12, %v359_v19  ;;  %v361_v21 = vpop.f32.mrb[3].mxu1  ;;  %v504_v22 = vpop.f32.mrb[2].mxu0 }
 0x135   : > { %v506_v23 = vpop.f32.mrb[3].mxu0 }
 0x136   : > { %v505_v24 = vadd.f32 %v504_v22, %v360_v20 }
 0x137   : > { %v364_v25 = vpop.f32.mrb[4].mxu1 }
 0x138   : > { %580 = vst.msk [vmem:[%s1115_s25 + $0x8] sm:$0xff] %vm578_vm0, %v505_v24  ;;  %v365_v26 = vadd.f32 %v1109_v12, %v364_v25  ;;  %v366_v27 = vpop.f32.mrb[5].mxu1  ;;  %v509_v28 = vpop.f32.mrb[4].mxu0 }
 0x139   : > { %v511_v29 = vpop.f32.mrb[5].mxu0 }
 0x13a   : > { %v510_v30 = vadd.f32 %v509_v28, %v365_v26 }
 0x13b   : > { %v369_v31 = vpop.f32.mrb[6].mxu1 }
 0x13c   : > { %581 = vst.msk [vmem:[%s1115_s25 + $0x10] sm:$0xff] %vm578_vm0, %v510_v30  ;;  %v370_v32 = vadd.f32 %v1109_v12, %v369_v31  ;;  %v371_v33 = vpop.f32.mrb[7].mxu1  ;;  %v514_v34 = vpop.f32.mrb[6].mxu0 }
 0x13d   : > { %v516_v35 = vpop.f32.mrb[7].mxu0 }
 0x13e   : > { %v515_v36 = vadd.f32 %v514_v34, %v370_v32 }
 0x13f   : > { %v374_v37 = vpop.f32.mrb[8].mxu1 }
 0x140   : > { %582 = vst.msk [vmem:[%s1115_s25 + $0x18] sm:$0xff] %vm578_vm0, %v515_v36  ;;  %v375_v38 = vadd.f32 %v1109_v12, %v374_v37  ;;  %v376_v39 = vpop.f32.mrb[9].mxu1  ;;  %v519_v40 = vpop.f32.mrb[8].mxu0 }
 0x141   : > { %v521_v41 = vpop.f32.mrb[9].mxu0 }
 0x142   : > { %v520_v42 = vadd.f32 %v519_v40, %v375_v38 }
 0x143   : > { %v379_v43 = vpop.f32.mrb[10].mxu1 }
 0x144   : > { %583 = vst.msk [vmem:[%s1115_s25 + $0x20] sm:$0xff] %vm578_vm0, %v520_v42  ;;  %v380_v44 = vadd.f32 %v1109_v12, %v379_v43  ;;  %v381_v45 = vpop.f32.mrb[11].mxu1  ;;  %v524_v46 = vpop.f32.mrb[10].mxu0 }
 0x145   : > { %v526_v47 = vpop.f32.mrb[11].mxu0 }
 0x146   : > { %v525_v48 = vadd.f32 %v524_v46, %v380_v44 }
 0x147   : > { %v384_v49 = vpop.f32.mrb[12].mxu1 }
 0x148   : > { %584 = vst.msk [vmem:[%s1115_s25 + $0x28] sm:$0xff] %vm578_vm0, %v525_v48  ;;  %v385_v50 = vadd.f32 %v1109_v12, %v384_v49  ;;  %v386_v51 = vpop.f32.mrb[13].mxu1  ;;  %v529_v52 = vpop.f32.mrb[12].mxu0 }
 0x149   : > { %v531_v53 = vpop.f32.mrb[13].mxu0 }
 0x14a   : > { %v530_v54 = vadd.f32 %v529_v52, %v385_v50 }
 0x14b   : > { %v389_v55 = vpop.f32.mrb[14].mxu1 }
 0x14c   : > { %585 = vst.msk [vmem:[%s1115_s25 + $0x30] sm:$0xff] %vm578_vm0, %v530_v54  ;;  %v390_v56 = vadd.f32 %v1109_v12, %v389_v55  ;;  %v391_v57 = vpop.f32.mrb[15].mxu1  ;;  %v534_v58 = vpop.f32.mrb[14].mxu0 }
 0x14d   : > { %v536_v59 = vpop.f32.mrb[15].mxu0 }
 0x14e   : > { %v535_v60 = vadd.f32 %v534_v58, %v390_v56 }
 0x14f   : > { %v394_v61 = vpop.f32.mrb[16].mxu1 }
 0x150   : > { %586 = vst.msk [vmem:[%s1115_s25 + $0x38] sm:$0xff] %vm578_vm0, %v535_v60  ;;  %v395_v62 = vadd.f32 %v1109_v12, %v394_v61  ;;  %v396_v63 = vpop.f32.mrb[17].mxu1  ;;  %v539_v0 = vpop.f32.mrb[16].mxu0 }
 0x151   : > { %v541_v1 = vpop.f32.mrb[17].mxu0 }
 0x152   : > { %v540_v2 = vadd.f32 %v539_v0, %v395_v62 }
 0x153   : > { %v399_v3 = vpop.f32.mrb[18].mxu1 }
 0x154   : > { %587 = vst.msk [vmem:[%s1115_s25 + $0x40] sm:$0xff] %vm578_vm0, %v540_v2  ;;  %v400_v4 = vadd.f32 %v1109_v12, %v399_v3  ;;  %v401_v5 = vpop.f32.mrb[19].mxu1  ;;  %v544_v6 = vpop.f32.mrb[18].mxu0 }
 0x155   : > { %v546_v7 = vpop.f32.mrb[19].mxu0 }
 0x156   : > { %v545_v8 = vadd.f32 %v544_v6, %v400_v4 }
 0x157   : > { %v404_v9 = vpop.f32.mrb[20].mxu1 }
 0x158   : > { %588 = vst.msk [vmem:[%s1115_s25 + $0x48] sm:$0xff] %vm578_vm0, %v545_v8  ;;  %v405_v10 = vadd.f32 %v1109_v12, %v404_v9  ;;  %v406_v11 = vpop.f32.mrb[21].mxu1  ;;  %v549_v13 = vpop.f32.mrb[20].mxu0 }
 0x159   : > { %v551_v14 = vpop.f32.mrb[21].mxu0 }
 0x15a   : > { %v550_v15 = vadd.f32 %v549_v13, %v405_v10 }
 0x15b   : > { %v409_v16 = vpop.f32.mrb[22].mxu1 }
 0x15c   : > { %589 = vst.msk [vmem:[%s1115_s25 + $0x50] sm:$0xff] %vm578_vm0, %v550_v15  ;;  %v410_v17 = vadd.f32 %v1109_v12, %v409_v16  ;;  %v411_v18 = vpop.f32.mrb[23].mxu1  ;;  %v554_v19 = vpop.f32.mrb[22].mxu0 }
 0x15d   : > { %v556_v20 = vpop.f32.mrb[23].mxu0 }
 0x15e   : > { %v555_v21 = vadd.f32 %v554_v19, %v410_v17 }
 0x15f   : > { %v414_v22 = vpop.f32.mrb[24].mxu1 }
 0x160   : > { %590 = vst.msk [vmem:[%s1115_s25 + $0x58] sm:$0xff] %vm578_vm0, %v555_v21  ;;  %v415_v23 = vadd.f32 %v1109_v12, %v414_v22  ;;  %v416_v24 = vpop.f32.mrb[25].mxu1  ;;  %v559_v25 = vpop.f32.mrb[24].mxu0 }
 0x161   : > { %v561_v26 = vpop.f32.mrb[25].mxu0 }
 0x162   : > { %v560_v27 = vadd.f32 %v559_v25, %v415_v23 }
 0x163   : > { %v419_v28 = vpop.f32.mrb[26].mxu1 }
 0x164   : > { %591 = vst.msk [vmem:[%s1115_s25 + $0x60] sm:$0xff] %vm578_vm0, %v560_v27  ;;  %v420_v29 = vadd.f32 %v1109_v12, %v419_v28  ;;  %v421_v30 = vpop.f32.mrb[27].mxu1  ;;  %v564_v31 = vpop.f32.mrb[26].mxu0 }
 0x165   : > { %v566_v32 = vpop.f32.mrb[27].mxu0 }
 0x166   : > { %v565_v33 = vadd.f32 %v564_v31, %v420_v29 }
 0x167   : > { %v424_v34 = vpop.f32.mrb[28].mxu1 }
 0x168   : > { %592 = vst.msk [vmem:[%s1115_s25 + $0x68] sm:$0xff] %vm578_vm0, %v565_v33  ;;  %v425_v35 = vadd.f32 %v1109_v12, %v424_v34  ;;  %v426_v36 = vpop.f32.mrb[29].mxu1  ;;  %v569_v37 = vpop.f32.mrb[28].mxu0 }
 0x169   : > { %v571_v38 = vpop.f32.mrb[29].mxu0 }
 0x16a   : > { %v570_v39 = vadd.f32 %v569_v37, %v425_v35 }
 0x16b   : > { %v429_v40 = vpop.f32.mrb[30].mxu1 }
 0x16c   : > { %593 = vst.msk [vmem:[%s1115_s25 + $0x70] sm:$0xff] %vm578_vm0, %v570_v39  ;;  %v430_v41 = vadd.f32 %v1109_v12, %v429_v40  ;;  %v431_v42 = vpop.f32.mrb[31].mxu1  ;;  %v574_v43 = vpop.f32.mrb[30].mxu0 }
 0x16d   : > { %v576_v44 = vpop.f32.mrb[31].mxu0 }
 0x16e   : > { %v575_v45 = vadd.f32 %v574_v43, %v430_v41 }
 0x170   : > { %594 = vst.msk [vmem:[%s1115_s25 + $0x78] sm:$0xff] %vm578_vm0, %v575_v45 }
 0x171 PF: > { %p14_p6 = scmp.ge.s32.totalorder %s952_s23, 4   ;;  %s1193_s12 = smov %s871_s13 }
 0x172   : > { %s1194_s13 = smov %s875_s14  ;;  %s1195_s14 = smov %s981_s11 }
 0x173   : > { %s1196_s15 = smov %s952_s23  ;;  %16 = sbr.rel (!%p14_p6) target bundleno = 4 (0x4), region = 76 }
 0x17a   :  { %617 = vsyncpa [#allocation3], 1 }
 0x17b   :  { %619 = vsyncpa [#allocation3 + $0x1], 1 }
 0x17c   :  { %620 = vsyncpa [#allocation5], 1 }

</bundles_post_ra>
